<compile_context>
chip_gen: v5e
topology: v5e:2x2
jax: 0.10.0
libtpu: 0.0.40
codegen_flags: <defaults>
</compile_context>

<pallas_src>
import functools

import jax
import jax.numpy as jnp
from jax.experimental import pallas as pl
from jax.experimental.pallas import tpu as pltpu

_LANES = 128     # lane-dense channel padding
_ALIGN = 16      # node / edge / graph row padding (bf16 sublane packing)
_BN_EPS = 1e-5


def _round_up(v, m):
    return ((v + m - 1) // m) * m


def _pad2(a, rows, cols, dtype=None):
    a = jnp.asarray(a, jnp.float32)
    r, c = a.shape
    out = jnp.pad(a, ((0, rows - r), (0, cols - c)))
    return out if dtype is None else out.astype(dtype)


def _pad_row(v, cols, fill=0.0):
    v = jnp.asarray(v, jnp.float32).reshape(1, -1)
    return jnp.pad(v, ((0, 0), (0, cols - v.shape[1])), constant_values=fill)


# ----------------------------- fused Pallas kernel ---------------------------

def _fused_kernel(eps_ref,                                   # SMEM (2,) f32
                  x_ref, ea_ref, src_ref, dst_ref, bat_ref,  # VMEM
                  ew1_ref, eb1_ref, w11_ref, b11_ref, w12_ref, b12_ref, s12_ref, t12_ref,
                  ew2_ref, eb2_ref, w21_ref, b21_ref, w22_ref, b22_ref, s22_ref, t22_ref,
                  l1a_ref, l1b_ref, l1bias_ref, l2w_ref, l2b_ref,
                  o_ref):
    f32 = jnp.float32
    bf16 = jnp.bfloat16
    E = ea_ref.shape[0]
    N = x_ref.shape[0]
    B = o_ref.shape[0]

    def mxu(a, b):
        # bf16 MXU matmul, f32 accumulate.
        return jnp.dot(a.astype(bf16), b.astype(bf16), preferred_element_type=f32)

    # Graph operators built in-register from the index vectors (exact in bf16):
    # the E*N / N*E / B*N one-hot matrices never touch HBM.
    gather = jnp.where(
        src_ref[...] == jax.lax.broadcasted_iota(jnp.int32, (E, N), 1),
        1.0, 0.0).astype(bf16)                               # [E, N]  x_j selector
    scatter = jnp.where(
        dst_ref[...] == jax.lax.broadcasted_iota(jnp.int32, (N, E), 0),
        1.0, 0.0).astype(bf16)                               # [N, E]  scatter-add
    pool = jnp.where(
        bat_ref[...] == jax.lax.broadcasted_iota(jnp.int32, (B, N), 0),
        1.0, 0.0).astype(bf16)                               # [B, N]  global_add_pool

    ea = ea_ref[...]

    def gin_layer(x, ew, eb, w1, b1, w2, b2, s2, t2, eps):
        # message(x_j, edge_attr) = relu(x_j + Linear(edge_attr))
        e = mxu(ea, ew[...]) + eb[...]                       # [E, P]
        xj = mxu(gather, x)                                  # [E, P]
        msg = jnp.maximum(xj + e, 0.0)
        # aggr='add' then + (1 + eps) * x
        out = mxu(scatter, msg) + (1.0 + eps) * x            # [N, P]
        # mlp: Lin1(+BN1 folded) -> ReLU -> (Drop=id) -> Lin2 -> ReLU -> (Drop=id) -> BN2
        h = jnp.maximum(mxu(out, w1[...]) + b1[...], 0.0)
        h = jnp.maximum(mxu(h, w2[...]) + b2[...], 0.0) * s2[...] + t2[...]
        return h

    x0 = x_ref[...]
    x1 = gin_layer(x0, ew1_ref, eb1_ref, w11_ref, b11_ref, w12_ref, b12_ref,
                   s12_ref, t12_ref, eps_ref[0])
    x2 = gin_layer(x1, ew2_ref, eb2_ref, w21_ref, b21_ref, w22_ref, b22_ref,
                   s22_ref, t22_ref, eps_ref[1])

    # global_add_pool on MXU; concat([x1p, x2p]) folded into split lin1 weights.
    x1p = mxu(pool, x1)                                      # [B, P]
    x2p = mxu(pool, x2)
    h = jnp.maximum(mxu(x1p, l1a_ref[...]) + mxu(x2p, l1b_ref[...]) + l1bias_ref[...], 0.0)
    # F.dropout(p=0.5, training=False) -> identity
    logit = mxu(h, l2w_ref[...]) + l2b_ref[...]
    o_ref[...] = jax.nn.sigmoid(logit)                       # [B, P]; col 0 is the output


# ----------------------------- parameter init --------------------------------

def _init_linear(key, out_f, in_f):
    k1, k2 = jax.random.split(key)
    w = jax.random.normal(k1, (out_f, in_f), jnp.float32) * 0.1
    b = jax.random.normal(k2, (out_f,), jnp.float32) * 0.1
    return w, b


def _init_gin(key, in_ch, out_ch, edge_dim):
    k = jax.random.split(key, 3)
    p = {}
    p["lin_w"], p["lin_b"] = _init_linear(k[0], in_ch, edge_dim)
    p["eps"] = jnp.float32(0.0)                              # zeroed in reset_parameters
    p["w1"], p["b1"] = _init_linear(k[1], out_ch, in_ch)
    p["w2"], p["b2"] = _init_linear(k[2], out_ch, out_ch)
    for i in (1, 2):
        p[f"bn{i}_gamma"] = jnp.ones((out_ch,), jnp.float32)
        p[f"bn{i}_beta"] = jnp.zeros((out_ch,), jnp.float32)
        p[f"bn{i}_mean"] = jnp.zeros((out_ch,), jnp.float32)
        p[f"bn{i}_var"] = jnp.ones((out_ch,), jnp.float32)
    return p


def init_params(key, in_channels, hidden_channels, edge_dimension):
    k = jax.random.split(key, 4)
    params = {
        "gin1": _init_gin(k[0], in_channels, hidden_channels, edge_dimension),
        "gin2": _init_gin(k[1], hidden_channels, hidden_channels, edge_dimension),
    }
    params["lin1_w"], params["lin1_b"] = _init_linear(k[2], 2 * hidden_channels,
                                                      2 * hidden_channels)
    params["lin2_w"], params["lin2_b"] = _init_linear(k[3], 1, 2 * hidden_channels)
    return params


def fold_params(params, hidden_channels, pad=_LANES):
    """One-time prep: transpose weights, fold inference BN, pad to 128 lanes, cast bf16."""
    H = hidden_channels
    bf16 = jnp.bfloat16

    def fold_gin(p):
        ew = _pad2(p["lin_w"].T, pad, pad, bf16)             # edge linear (in-major)
        eb = _pad_row(p["lin_b"], pad)
        s1 = p["bn1_gamma"] / jnp.sqrt(p["bn1_var"] + _BN_EPS)
        w1f = p["w1"] * s1[:, None]                          # BN1 folded into Lin1
        b1f = (p["b1"] - p["bn1_mean"]) * s1 + p["bn1_beta"]
        w1 = _pad2(w1f.T, pad, pad, bf16)
        b1 = _pad_row(b1f, pad)
        w2 = _pad2(p["w2"].T, pad, pad, bf16)
        b2 = _pad_row(p["b2"], pad)
        s2 = p["bn2_gamma"] / jnp.sqrt(p["bn2_var"] + _BN_EPS)
        t2 = p["bn2_beta"] - p["bn2_mean"] * s2
        return (ew, eb, w1, b1, w2, b2, _pad_row(s2, pad, fill=1.0), _pad_row(t2, pad))

    g1 = fold_gin(params["gin1"])
    g2 = fold_gin(params["gin2"])

    w1T = params["lin1_w"].T                                 # [2H(in), 2H(out)]
    head = (_pad2(w1T[:H, :], pad, pad, bf16),               # acts on pooled x1
            _pad2(w1T[H:, :], pad, pad, bf16),               # acts on pooled x2
            _pad_row(params["lin1_b"], pad),
            _pad2(params["lin2_w"].T, pad, pad, bf16),
            _pad_row(params["lin2_b"], pad))

    eps = jnp.stack([params["gin1"]["eps"], params["gin2"]["eps"]]).astype(jnp.float32)
    return {"eps": eps, "gin1": g1, "gin2": g2, "head": head}


# ------------------------------- forward --------------------------------------

@functools.partial(jax.jit, static_argnames=("num_graphs",))
def ginmolbbbp_forward(folded, x, edge_index, edge_attr, batch, *, num_graphs):
    P = _LANES
    N, _ = x.shape
    E = edge_index.shape[1]
    Np = _round_up(N, _ALIGN)
    Ep = _round_up(E, _ALIGN)
    Bp = _round_up(num_graphs, _ALIGN)

    # Pad features to lane-dense [rows_pad, 128]; pad rows with sentinels so that
    # padded edges are dropped by the scatter (dst=-1) and padded nodes are never
    # pooled (batch=-1).
    xp = _pad2(x, Np, P)
    eap = _pad2(edge_attr, Ep, P)
    src = jnp.zeros((Ep,), jnp.int32).at[:E].set(edge_index[0].astype(jnp.int32)).reshape(Ep, 1)
    dst = jnp.full((Ep,), -1, jnp.int32).at[:E].set(edge_index[1].astype(jnp.int32)).reshape(1, Ep)
    bat = jnp.full((Np,), -1, jnp.int32).at[:N].set(batch.astype(jnp.int32)).reshape(1, Np)

    vmem = pl.BlockSpec(memory_space=pltpu.MemorySpace.VMEM)
    smem = pl.BlockSpec(memory_space=pltpu.MemorySpace.SMEM)

    out = pl.pallas_call(
        _fused_kernel,
        out_shape=jax.ShapeDtypeStruct((Bp, P), jnp.float32),
        in_specs=[smem] + [vmem] * 26,
        out_specs=vmem,
    )(folded["eps"], xp, eap, src, dst, bat,
      *folded["gin1"], *folded["gin2"], *folded["head"])

    return out[:num_graphs, :1]


# --------------------------------- main ----------------------------------------

if __name__ == "__main__":
    in_channels = 8
    hidden_channels = 16
    edge_dimension = 4
    num_nodes = 12
    num_edges = 24
    num_graphs = 2

    key = jax.random.PRNGKey(0)
    k_param, k_x, k_ei, k_ea = jax.random.split(key, 4)

    params = init_params(k_param, in_channels, hidden_channels, edge_dimension)
    folded = fold_params(params, hidden_channels)

    x = jax.random.normal(k_x, (num_nodes, in_channels), jnp.float32)
    edge_index = jax.random.randint(k_ei, (2, num_edges), 0, num_nodes, jnp.int32)
    edge_attr = jax.random.normal(k_ea, (num_edges, edge_dimension), jnp.float32)
    batch = jnp.array([0] * (num_nodes // 2) + [1] * (num_nodes - num_nodes // 2),
                      dtype=jnp.int32)

    out = ginmolbbbp_forward(folded, x, edge_index, edge_attr, batch,
                             num_graphs=num_graphs)
    out = jax.block_until_ready(out)
    assert out.shape == (num_graphs, 1)
    assert bool(jnp.all((out >= 0.0) & (out <= 1.0)))
    print("KERNEL_OK")
</pallas_src>

<mosaic_0001>
module attributes {stable_mosaic.version = 11 : i64} {
  func.func @_fused_kernel(%arg0: memref<2xf32, #tpu.memory_space<smem>>, %arg1: memref<16x128xf32, #tpu.memory_space<vmem>>, %arg2: memref<32x128xf32, #tpu.memory_space<vmem>>, %arg3: memref<32x1xi32, #tpu.memory_space<vmem>>, %arg4: memref<1x32xi32, #tpu.memory_space<vmem>>, %arg5: memref<1x16xi32, #tpu.memory_space<vmem>>, %arg6: memref<128x128xbf16, #tpu.memory_space<vmem>>, %arg7: memref<1x128xf32, #tpu.memory_space<vmem>>, %arg8: memref<128x128xbf16, #tpu.memory_space<vmem>>, %arg9: memref<1x128xf32, #tpu.memory_space<vmem>>, %arg10: memref<128x128xbf16, #tpu.memory_space<vmem>>, %arg11: memref<1x128xf32, #tpu.memory_space<vmem>>, %arg12: memref<1x128xf32, #tpu.memory_space<vmem>>, %arg13: memref<1x128xf32, #tpu.memory_space<vmem>>, %arg14: memref<128x128xbf16, #tpu.memory_space<vmem>>, %arg15: memref<1x128xf32, #tpu.memory_space<vmem>>, %arg16: memref<128x128xbf16, #tpu.memory_space<vmem>>, %arg17: memref<1x128xf32, #tpu.memory_space<vmem>>, %arg18: memref<128x128xbf16, #tpu.memory_space<vmem>>, %arg19: memref<1x128xf32, #tpu.memory_space<vmem>>, %arg20: memref<1x128xf32, #tpu.memory_space<vmem>>, %arg21: memref<1x128xf32, #tpu.memory_space<vmem>>, %arg22: memref<128x128xbf16, #tpu.memory_space<vmem>>, %arg23: memref<128x128xbf16, #tpu.memory_space<vmem>>, %arg24: memref<1x128xf32, #tpu.memory_space<vmem>>, %arg25: memref<128x128xbf16, #tpu.memory_space<vmem>>, %arg26: memref<1x128xf32, #tpu.memory_space<vmem>>, %arg27: memref<16x128xf32, #tpu.memory_space<vmem>>) attributes {dimension_semantics = [], scalar_prefetch = 0 : i64, scratch_operands = 0 : i64, tpu.core_type = #tpu.core_type<tc>} {
    %c0 = arith.constant 0 : index
    %c0_0 = arith.constant 0 : index
    %0 = vector.load %arg3[%c0, %c0_0] : memref<32x1xi32, #tpu.memory_space<vmem>>, vector<32x1xi32>
    %1 = tpu.iota {dimensions = array<i32: 1>} : vector<32x16xi32>
    %2 = vector.broadcast %0 : vector<32x1xi32> to vector<32x16xi32>
    %3 = arith.cmpi eq, %2, %1 : vector<32x16xi32>
    %cst = arith.constant 1.000000e+00 : f32
    %cst_1 = arith.constant 0.000000e+00 : f32
    %4 = vector.broadcast %cst : f32 to vector<32x16xf32>
    %5 = vector.broadcast %cst_1 : f32 to vector<32x16xf32>
    %6 = arith.select %3, %4, %5 : vector<32x16xi1>, vector<32x16xf32>
    %7 = arith.truncf %6 : vector<32x16xf32> to vector<32x16xbf16>
    %c0_2 = arith.constant 0 : index
    %c0_3 = arith.constant 0 : index
    %8 = vector.load %arg4[%c0_2, %c0_3] : memref<1x32xi32, #tpu.memory_space<vmem>>, vector<1x32xi32>
    %9 = tpu.iota {dimensions = array<i32: 0>} : vector<16x32xi32>
    %10 = vector.broadcast %8 : vector<1x32xi32> to vector<16x32xi32>
    %11 = arith.cmpi eq, %10, %9 : vector<16x32xi32>
    %cst_4 = arith.constant 1.000000e+00 : f32
    %cst_5 = arith.constant 0.000000e+00 : f32
    %12 = vector.broadcast %cst_4 : f32 to vector<16x32xf32>
    %13 = vector.broadcast %cst_5 : f32 to vector<16x32xf32>
    %14 = arith.select %11, %12, %13 : vector<16x32xi1>, vector<16x32xf32>
    %15 = arith.truncf %14 : vector<16x32xf32> to vector<16x32xbf16>
    %c0_6 = arith.constant 0 : index
    %c0_7 = arith.constant 0 : index
    %16 = vector.load %arg5[%c0_6, %c0_7] : memref<1x16xi32, #tpu.memory_space<vmem>>, vector<1x16xi32>
    %17 = tpu.iota {dimensions = array<i32: 0>} : vector<16x16xi32>
    %18 = vector.broadcast %16 : vector<1x16xi32> to vector<16x16xi32>
    %19 = arith.cmpi eq, %18, %17 : vector<16x16xi32>
    %cst_8 = arith.constant 1.000000e+00 : f32
    %cst_9 = arith.constant 0.000000e+00 : f32
    %20 = vector.broadcast %cst_8 : f32 to vector<16x16xf32>
    %21 = vector.broadcast %cst_9 : f32 to vector<16x16xf32>
    %22 = arith.select %19, %20, %21 : vector<16x16xi1>, vector<16x16xf32>
    %23 = arith.truncf %22 : vector<16x16xf32> to vector<16x16xbf16>
    %c0_10 = arith.constant 0 : index
    %c0_11 = arith.constant 0 : index
    %24 = vector.load %arg2[%c0_10, %c0_11] : memref<32x128xf32, #tpu.memory_space<vmem>>, vector<32x128xf32>
    %c0_12 = arith.constant 0 : index
    %c0_13 = arith.constant 0 : index
    %25 = vector.load %arg1[%c0_12, %c0_13] : memref<16x128xf32, #tpu.memory_space<vmem>>, vector<16x128xf32>
    %c0_14 = arith.constant 0 : index
    %26 = memref.load %arg0[%c0_14] : memref<2xf32, #tpu.memory_space<smem>>
    %c0_15 = arith.constant 0 : index
    %c0_16 = arith.constant 0 : index
    %27 = vector.load %arg6[%c0_15, %c0_16] : memref<128x128xbf16, #tpu.memory_space<vmem>>, vector<128x128xbf16>
    %28 = arith.truncf %24 : vector<32x128xf32> to vector<32x128xbf16>
    %cst_17 = arith.constant dense<0.000000e+00> : vector<32x128xf32>
    %29 = tpu.matmul %28, %27, %cst_17 {dimension_numbers = #tpu.dot_dimension_numbers<[1], [0], [0], [1], [0, 0, 1, 1], [], []>} : vector<32x128xbf16>, vector<128x128xbf16>, vector<32x128xf32> -> vector<32x128xf32>
    %c0_18 = arith.constant 0 : index
    %c0_19 = arith.constant 0 : index
    %30 = vector.load %arg7[%c0_18, %c0_19] : memref<1x128xf32, #tpu.memory_space<vmem>>, vector<1x128xf32>
    %31 = vector.broadcast %30 : vector<1x128xf32> to vector<32x128xf32>
    %32 = arith.addf %29, %31 : vector<32x128xf32>
    %33 = arith.truncf %25 : vector<16x128xf32> to vector<16x128xbf16>
    %cst_20 = arith.constant dense<0.000000e+00> : vector<32x128xf32>
    %34 = tpu.matmul %7, %33, %cst_20 {dimension_numbers = #tpu.dot_dimension_numbers<[1], [0], [0], [1], [0, 0, 1, 1], [], []>} : vector<32x16xbf16>, vector<16x128xbf16>, vector<32x128xf32> -> vector<32x128xf32>
    %35 = arith.addf %34, %32 : vector<32x128xf32>
    %cst_21 = arith.constant 0.000000e+00 : f32
    %36 = vector.broadcast %cst_21 : f32 to vector<32x128xf32>
    %37 = arith.maximumf %35, %36 : vector<32x128xf32>
    %38 = arith.truncf %37 : vector<32x128xf32> to vector<32x128xbf16>
    %cst_22 = arith.constant dense<0.000000e+00> : vector<16x128xf32>
    %39 = tpu.matmul %15, %38, %cst_22 {dimension_numbers = #tpu.dot_dimension_numbers<[1], [0], [0], [1], [0, 0, 1, 1], [], []>} : vector<16x32xbf16>, vector<32x128xbf16>, vector<16x128xf32> -> vector<16x128xf32>
    %cst_23 = arith.constant 1.000000e+00 : f32
    %40 = arith.addf %cst_23, %26 : f32
    %41 = vector.broadcast %40 : f32 to vector<16x128xf32>
    %42 = arith.mulf %41, %25 : vector<16x128xf32>
    %43 = arith.addf %39, %42 : vector<16x128xf32>
    %c0_24 = arith.constant 0 : index
    %c0_25 = arith.constant 0 : index
    %44 = vector.load %arg8[%c0_24, %c0_25] : memref<128x128xbf16, #tpu.memory_space<vmem>>, vector<128x128xbf16>
    %45 = arith.truncf %43 : vector<16x128xf32> to vector<16x128xbf16>
    %cst_26 = arith.constant dense<0.000000e+00> : vector<16x128xf32>
    %46 = tpu.matmul %45, %44, %cst_26 {dimension_numbers = #tpu.dot_dimension_numbers<[1], [0], [0], [1], [0, 0, 1, 1], [], []>} : vector<16x128xbf16>, vector<128x128xbf16>, vector<16x128xf32> -> vector<16x128xf32>
    %c0_27 = arith.constant 0 : index
    %c0_28 = arith.constant 0 : index
    %47 = vector.load %arg9[%c0_27, %c0_28] : memref<1x128xf32, #tpu.memory_space<vmem>>, vector<1x128xf32>
    %48 = vector.broadcast %47 : vector<1x128xf32> to vector<16x128xf32>
    %49 = arith.addf %46, %48 : vector<16x128xf32>
    %cst_29 = arith.constant 0.000000e+00 : f32
    %50 = vector.broadcast %cst_29 : f32 to vector<16x128xf32>
    %51 = arith.maximumf %49, %50 : vector<16x128xf32>
    %c0_30 = arith.constant 0 : index
    %c0_31 = arith.constant 0 : index
    %52 = vector.load %arg10[%c0_30, %c0_31] : memref<128x128xbf16, #tpu.memory_space<vmem>>, vector<128x128xbf16>
    %53 = arith.truncf %51 : vector<16x128xf32> to vector<16x128xbf16>
    %cst_32 = arith.constant dense<0.000000e+00> : vector<16x128xf32>
    %54 = tpu.matmul %53, %52, %cst_32 {dimension_numbers = #tpu.dot_dimension_numbers<[1], [0], [0], [1], [0, 0, 1, 1], [], []>} : vector<16x128xbf16>, vector<128x128xbf16>, vector<16x128xf32> -> vector<16x128xf32>
    %c0_33 = arith.constant 0 : index
    %c0_34 = arith.constant 0 : index
    %55 = vector.load %arg11[%c0_33, %c0_34] : memref<1x128xf32, #tpu.memory_space<vmem>>, vector<1x128xf32>
    %56 = vector.broadcast %55 : vector<1x128xf32> to vector<16x128xf32>
    %57 = arith.addf %54, %56 : vector<16x128xf32>
    %cst_35 = arith.constant 0.000000e+00 : f32
    %58 = vector.broadcast %cst_35 : f32 to vector<16x128xf32>
    %59 = arith.maximumf %57, %58 : vector<16x128xf32>
    %c0_36 = arith.constant 0 : index
    %c0_37 = arith.constant 0 : index
    %60 = vector.load %arg12[%c0_36, %c0_37] : memref<1x128xf32, #tpu.memory_space<vmem>>, vector<1x128xf32>
    %61 = vector.broadcast %60 : vector<1x128xf32> to vector<16x128xf32>
    %62 = arith.mulf %59, %61 : vector<16x128xf32>
    %c0_38 = arith.constant 0 : index
    %c0_39 = arith.constant 0 : index
    %63 = vector.load %arg13[%c0_38, %c0_39] : memref<1x128xf32, #tpu.memory_space<vmem>>, vector<1x128xf32>
    %64 = vector.broadcast %63 : vector<1x128xf32> to vector<16x128xf32>
    %65 = arith.addf %62, %64 : vector<16x128xf32>
    %c1 = arith.constant 1 : index
    %66 = memref.load %arg0[%c1] : memref<2xf32, #tpu.memory_space<smem>>
    %c0_40 = arith.constant 0 : index
    %c0_41 = arith.constant 0 : index
    %67 = vector.load %arg14[%c0_40, %c0_41] : memref<128x128xbf16, #tpu.memory_space<vmem>>, vector<128x128xbf16>
    %68 = arith.truncf %24 : vector<32x128xf32> to vector<32x128xbf16>
    %cst_42 = arith.constant dense<0.000000e+00> : vector<32x128xf32>
    %69 = tpu.matmul %68, %67, %cst_42 {dimension_numbers = #tpu.dot_dimension_numbers<[1], [0], [0], [1], [0, 0, 1, 1], [], []>} : vector<32x128xbf16>, vector<128x128xbf16>, vector<32x128xf32> -> vector<32x128xf32>
    %c0_43 = arith.constant 0 : index
    %c0_44 = arith.constant 0 : index
    %70 = vector.load %arg15[%c0_43, %c0_44] : memref<1x128xf32, #tpu.memory_space<vmem>>, vector<1x128xf32>
    %71 = vector.broadcast %70 : vector<1x128xf32> to vector<32x128xf32>
    %72 = arith.addf %69, %71 : vector<32x128xf32>
    %73 = arith.truncf %65 : vector<16x128xf32> to vector<16x128xbf16>
    %cst_45 = arith.constant dense<0.000000e+00> : vector<32x128xf32>
    %74 = tpu.matmul %7, %73, %cst_45 {dimension_numbers = #tpu.dot_dimension_numbers<[1], [0], [0], [1], [0, 0, 1, 1], [], []>} : vector<32x16xbf16>, vector<16x128xbf16>, vector<32x128xf32> -> vector<32x128xf32>
    %75 = arith.addf %74, %72 : vector<32x128xf32>
    %cst_46 = arith.constant 0.000000e+00 : f32
    %76 = vector.broadcast %cst_46 : f32 to vector<32x128xf32>
    %77 = arith.maximumf %75, %76 : vector<32x128xf32>
    %78 = arith.truncf %77 : vector<32x128xf32> to vector<32x128xbf16>
    %cst_47 = arith.constant dense<0.000000e+00> : vector<16x128xf32>
    %79 = tpu.matmul %15, %78, %cst_47 {dimension_numbers = #tpu.dot_dimension_numbers<[1], [0], [0], [1], [0, 0, 1, 1], [], []>} : vector<16x32xbf16>, vector<32x128xbf16>, vector<16x128xf32> -> vector<16x128xf32>
    %cst_48 = arith.constant 1.000000e+00 : f32
    %80 = arith.addf %cst_48, %66 : f32
    %81 = vector.broadcast %80 : f32 to vector<16x128xf32>
    %82 = arith.mulf %81, %65 : vector<16x128xf32>
    %83 = arith.addf %79, %82 : vector<16x128xf32>
    %c0_49 = arith.constant 0 : index
    %c0_50 = arith.constant 0 : index
    %84 = vector.load %arg16[%c0_49, %c0_50] : memref<128x128xbf16, #tpu.memory_space<vmem>>, vector<128x128xbf16>
    %85 = arith.truncf %83 : vector<16x128xf32> to vector<16x128xbf16>
    %cst_51 = arith.constant dense<0.000000e+00> : vector<16x128xf32>
    %86 = tpu.matmul %85, %84, %cst_51 {dimension_numbers = #tpu.dot_dimension_numbers<[1], [0], [0], [1], [0, 0, 1, 1], [], []>} : vector<16x128xbf16>, vector<128x128xbf16>, vector<16x128xf32> -> vector<16x128xf32>
    %c0_52 = arith.constant 0 : index
    %c0_53 = arith.constant 0 : index
    %87 = vector.load %arg17[%c0_52, %c0_53] : memref<1x128xf32, #tpu.memory_space<vmem>>, vector<1x128xf32>
    %88 = vector.broadcast %87 : vector<1x128xf32> to vector<16x128xf32>
    %89 = arith.addf %86, %88 : vector<16x128xf32>
    %cst_54 = arith.constant 0.000000e+00 : f32
    %90 = vector.broadcast %cst_54 : f32 to vector<16x128xf32>
    %91 = arith.maximumf %89, %90 : vector<16x128xf32>
    %c0_55 = arith.constant 0 : index
    %c0_56 = arith.constant 0 : index
    %92 = vector.load %arg18[%c0_55, %c0_56] : memref<128x128xbf16, #tpu.memory_space<vmem>>, vector<128x128xbf16>
    %93 = arith.truncf %91 : vector<16x128xf32> to vector<16x128xbf16>
    %cst_57 = arith.constant dense<0.000000e+00> : vector<16x128xf32>
    %94 = tpu.matmul %93, %92, %cst_57 {dimension_numbers = #tpu.dot_dimension_numbers<[1], [0], [0], [1], [0, 0, 1, 1], [], []>} : vector<16x128xbf16>, vector<128x128xbf16>, vector<16x128xf32> -> vector<16x128xf32>
    %c0_58 = arith.constant 0 : index
    %c0_59 = arith.constant 0 : index
    %95 = vector.load %arg19[%c0_58, %c0_59] : memref<1x128xf32, #tpu.memory_space<vmem>>, vector<1x128xf32>
    %96 = vector.broadcast %95 : vector<1x128xf32> to vector<16x128xf32>
    %97 = arith.addf %94, %96 : vector<16x128xf32>
    %cst_60 = arith.constant 0.000000e+00 : f32
    %98 = vector.broadcast %cst_60 : f32 to vector<16x128xf32>
    %99 = arith.maximumf %97, %98 : vector<16x128xf32>
    %c0_61 = arith.constant 0 : index
    %c0_62 = arith.constant 0 : index
    %100 = vector.load %arg20[%c0_61, %c0_62] : memref<1x128xf32, #tpu.memory_space<vmem>>, vector<1x128xf32>
    %101 = vector.broadcast %100 : vector<1x128xf32> to vector<16x128xf32>
    %102 = arith.mulf %99, %101 : vector<16x128xf32>
    %c0_63 = arith.constant 0 : index
    %c0_64 = arith.constant 0 : index
    %103 = vector.load %arg21[%c0_63, %c0_64] : memref<1x128xf32, #tpu.memory_space<vmem>>, vector<1x128xf32>
    %104 = vector.broadcast %103 : vector<1x128xf32> to vector<16x128xf32>
    %105 = arith.addf %102, %104 : vector<16x128xf32>
    %106 = arith.truncf %65 : vector<16x128xf32> to vector<16x128xbf16>
    %cst_65 = arith.constant dense<0.000000e+00> : vector<16x128xf32>
    %107 = tpu.matmul %23, %106, %cst_65 {dimension_numbers = #tpu.dot_dimension_numbers<[1], [0], [0], [1], [0, 0, 1, 1], [], []>} : vector<16x16xbf16>, vector<16x128xbf16>, vector<16x128xf32> -> vector<16x128xf32>
    %108 = arith.truncf %105 : vector<16x128xf32> to vector<16x128xbf16>
    %cst_66 = arith.constant dense<0.000000e+00> : vector<16x128xf32>
    %109 = tpu.matmul %23, %108, %cst_66 {dimension_numbers = #tpu.dot_dimension_numbers<[1], [0], [0], [1], [0, 0, 1, 1], [], []>} : vector<16x16xbf16>, vector<16x128xbf16>, vector<16x128xf32> -> vector<16x128xf32>
    %c0_67 = arith.constant 0 : index
    %c0_68 = arith.constant 0 : index
    %110 = vector.load %arg22[%c0_67, %c0_68] : memref<128x128xbf16, #tpu.memory_space<vmem>>, vector<128x128xbf16>
    %111 = arith.truncf %107 : vector<16x128xf32> to vector<16x128xbf16>
    %cst_69 = arith.constant dense<0.000000e+00> : vector<16x128xf32>
    %112 = tpu.matmul %111, %110, %cst_69 {dimension_numbers = #tpu.dot_dimension_numbers<[1], [0], [0], [1], [0, 0, 1, 1], [], []>} : vector<16x128xbf16>, vector<128x128xbf16>, vector<16x128xf32> -> vector<16x128xf32>
    %c0_70 = arith.constant 0 : index
    %c0_71 = arith.constant 0 : index
    %113 = vector.load %arg23[%c0_70, %c0_71] : memref<128x128xbf16, #tpu.memory_space<vmem>>, vector<128x128xbf16>
    %114 = arith.truncf %109 : vector<16x128xf32> to vector<16x128xbf16>
    %cst_72 = arith.constant dense<0.000000e+00> : vector<16x128xf32>
    %115 = tpu.matmul %114, %113, %cst_72 {dimension_numbers = #tpu.dot_dimension_numbers<[1], [0], [0], [1], [0, 0, 1, 1], [], []>} : vector<16x128xbf16>, vector<128x128xbf16>, vector<16x128xf32> -> vector<16x128xf32>
    %116 = arith.addf %112, %115 : vector<16x128xf32>
    %c0_73 = arith.constant 0 : index
    %c0_74 = arith.constant 0 : index
    %117 = vector.load %arg24[%c0_73, %c0_74] : memref<1x128xf32, #tpu.memory_space<vmem>>, vector<1x128xf32>
    %118 = vector.broadcast %117 : vector<1x128xf32> to vector<16x128xf32>
    %119 = arith.addf %116, %118 : vector<16x128xf32>
    %cst_75 = arith.constant 0.000000e+00 : f32
    %120 = vector.broadcast %cst_75 : f32 to vector<16x128xf32>
    %121 = arith.maximumf %119, %120 : vector<16x128xf32>
    %c0_76 = arith.constant 0 : index
    %c0_77 = arith.constant 0 : index
    %122 = vector.load %arg25[%c0_76, %c0_77] : memref<128x128xbf16, #tpu.memory_space<vmem>>, vector<128x128xbf16>
    %123 = arith.truncf %121 : vector<16x128xf32> to vector<16x128xbf16>
    %cst_78 = arith.constant dense<0.000000e+00> : vector<16x128xf32>
    %124 = tpu.matmul %123, %122, %cst_78 {dimension_numbers = #tpu.dot_dimension_numbers<[1], [0], [0], [1], [0, 0, 1, 1], [], []>} : vector<16x128xbf16>, vector<128x128xbf16>, vector<16x128xf32> -> vector<16x128xf32>
    %c0_79 = arith.constant 0 : index
    %c0_80 = arith.constant 0 : index
    %125 = vector.load %arg26[%c0_79, %c0_80] : memref<1x128xf32, #tpu.memory_space<vmem>>, vector<1x128xf32>
    %126 = vector.broadcast %125 : vector<1x128xf32> to vector<16x128xf32>
    %127 = arith.addf %124, %126 : vector<16x128xf32>
    %128 = arith.negf %127 : vector<16x128xf32>
    %129 = math.exp %128 : vector<16x128xf32>
    %cst_81 = arith.constant 1.000000e+00 : f32
    %130 = vector.broadcast %cst_81 : f32 to vector<16x128xf32>
    %131 = arith.addf %130, %129 : vector<16x128xf32>
    %132 = arith.divf %130, %131 : vector<16x128xf32>
    %c0_82 = arith.constant 0 : index
    %c0_83 = arith.constant 0 : index
    %133 = vector.load %arg27[%c0_82, %c0_83] : memref<16x128xf32, #tpu.memory_space<vmem>>, vector<16x128xf32>
    tpu.vector_store %arg27[%c0_82, %c0_83], %132 {strides = array<i32>} : memref<16x128xf32, #tpu.memory_space<vmem>>, vector<16x128xf32>,
    return
  }
}

</mosaic_0001>

<bundles_post_ra>
// kernel: ginmolbbbp_forward.1
= control target key start
LH: loop header
LB: loop body
LE: loop exit
PB: predicated region body
PF: predicated region fallthrough
CT: control target
= control target key end

     0   :  { %s2181_s0 = inlined_call_operand.vmem [shape: f32[2], index: 0, kind: input, shape index: {}]   ;;  %s2182_s1 = inlined_call_operand.vmem [shape: f32[16,128], index: 1, kind: input, shape index: {}]   ;;  %s2183_s2 = inlined_call_operand.vmem [shape: f32[32,128], index: 2, kind: input, shape index: {}]   ;;  %s2184_s3 = inlined_call_operand.vmem [shape: s32[32,1], index: 3, kind: input, shape index: {}]   ;;  %s2185_s4 = inlined_call_operand.vmem [shape: s32[1,32], index: 4, kind: input, shape index: {}]   ;;  %s2186_s5 = inlined_call_operand.vmem [shape: s32[1,16], index: 5, kind: input, shape index: {}]   ;;  %s2187_s6 = inlined_call_operand.vmem [shape: bf16[128,128], index: 6, kind: input, shape index: {}]   ;;  %s2188_s7 = inlined_call_operand.vmem [shape: f32[1,128], index: 7, kind: input, shape index: {}]   ;;  %s2189_s8 = inlined_call_operand.vmem [shape: bf16[128,128], index: 8, kind: input, shape index: {}]   ;;  %s2190_s9 = inlined_call_operand.vmem [shape: f32[1,128], index: 9, kind: input, shape index: {}]   ;;  %s2191_s10 = inlined_call_operand.vmem [shape: bf16[128,128], index: 10, kind: input, shape index: {}]   ;;  %s2192_s11 = inlined_call_operand.vmem [shape: f32[1,128], index: 11, kind: input, shape index: {}]   ;;  %s2193_s12 = inlined_call_operand.vmem [shape: f32[1,128], index: 12, kind: input, shape index: {}]   ;;  %s2194_s13 = inlined_call_operand.vmem [shape: f32[1,128], index: 13, kind: input, shape index: {}]   ;;  %s2195_s14 = inlined_call_operand.hbm [shape: bf16[128,128], index: 14, kind: input, shape index: {}]   ;;  %s2196_s15 = inlined_call_operand.vmem [shape: f32[1,128], index: 15, kind: input, shape index: {}]   ;;  %s2197_s16 = inlined_call_operand.hbm [shape: bf16[128,128], index: 16, kind: input, shape index: {}]   ;;  %s2198_s17 = inlined_call_operand.vmem [shape: f32[1,128], index: 17, kind: input, shape index: {}]   ;;  %s2199_s18 = inlined_call_operand.hbm [shape: bf16[128,128], index: 18, kind: input, shape index: {}]   ;;  %s2200_s19 = inlined_call_operand.vmem [shape: f32[1,128], index: 19, kind: input, shape index: {}]   ;;  %s2201_s20 = inlined_call_operand.vmem [shape: f32[1,128], index: 20, kind: input, shape index: {}]   ;;  %s2202_s21 = inlined_call_operand.vmem [shape: f32[1,128], index: 21, kind: input, shape index: {}]   ;;  %s2203_s22 = inlined_call_operand.hbm [shape: bf16[128,128], index: 22, kind: input, shape index: {}]   ;;  %s2204_s23 = inlined_call_operand.hbm [shape: bf16[128,128], index: 23, kind: input, shape index: {}]   ;;  %s2205_s24 = inlined_call_operand.vmem [shape: f32[1,128], index: 24, kind: input, shape index: {}]   ;;  %s2206_s25 = inlined_call_operand.hbm [shape: bf16[128,128], index: 25, kind: input, shape index: {}]   ;;  %s2207_s26 = inlined_call_operand.vmem [shape: f32[1,128], index: 26, kind: input, shape index: {}]   ;;  %s2208_s27 = inlined_call_operand.vmem [shape: f32[16,128], index: 27, kind: output, shape index: {}]  }
   0x1   :  { %2215 = sst [smem:[#allocation19_spill]] %s2181_s0 }
   0x2   :  { %2216 = sst [smem:[#allocation20_spill]] %s2182_s1 }
   0x3   :  { %2217 = sst [smem:[#allocation21_spill]] %s2183_s2 }
   0x4   :  { %2218 = sst [smem:[#allocation22_spill]] %s2184_s3 }
   0x5   :  { %2219 = sst [smem:[#allocation23_spill]] %s2185_s4 }
   0x6   :  { %2220 = sst [smem:[#allocation24_spill]] %s2186_s5 }
   0x7   :  { %2221 = sst [smem:[#allocation25_spill]] %s2187_s6 }
   0x8   :  { %2222 = sst [smem:[#allocation26_spill]] %s2188_s7 }
   0x9   :  { %2223 = sst [smem:[#allocation27_spill]] %s2189_s8 }
   0xa   :  { %2224 = sst [smem:[#allocation28_spill]] %s2190_s9 }
   0xb   :  { %2225 = sst [smem:[#allocation29_spill]] %s2191_s10 }
   0xc   :  { %2226 = sst [smem:[#allocation30_spill]] %s2192_s11 }
   0xd   :  { %32 = vsyncpa [#allocation4], 0 }
   0xe   :  { %33 = vsyncpa [#allocation3], 0 }
   0xf   :  { %34 = vsyncpa [#allocation7], 0 }
  0x10   :  { %35 = vsyncpa [#allocation10], 0 }
  0x11   :  { %36 = vsyncpa [#allocation13], 0  ;;  %s91_s8 = sshll.u32 %s2197_s16, 4  ;;  %s1788_s30 = smov [#allocation6]   ;;  %s92_s8 = int_to_ptr.hbm [resolvable:$true] %s91_s8 }
  0x12   :  { %s93_s9 = sshll.u32 %s1788_s30, 4  ;;  %s125_s0 = sshll.u32 %s2203_s22, 4  ;;  %s94_s9 = int_to_ptr.vmem [resolvable:$true] %s93_s9  ;;  %s126_s0 = int_to_ptr.hbm [resolvable:$true] %s125_s0 }
  0x13   :  { %s1789_s10 = smov 64   ;;  %s1790_s29 = smov 4  }
  0x14   :  { %99 = dma.hbm_to_vmem [thread:$0]  %s92_s8, 1024, %s94_s9, [#allocation7], %s1789_s10, %s1789_s10, %s1790_s29  }
  0x15   :  { %s1791_s1 = smov [#allocation9]   ;;  %s2227_s16 = sld [smem:[#allocation19_spill]] }
  0x16   :  { %s127_s6 = sshll.u32 %s1791_s1, 4  ;;  %s76_s4 = sshll.u32 %s2195_s14, 4  ;;  %s128_s6 = int_to_ptr.vmem [resolvable:$true] %s127_s6  ;;  %s77_s4 = int_to_ptr.hbm [resolvable:$true] %s76_s4 }
  0x17   :  { %133 = dma.hbm_to_vmem [thread:$0]  %s126_s0, 1024, %s128_s6, [#allocation10], %s1789_s10, %s1789_s10, %s1790_s29  }
  0x18   :  { %s1792_s30 = smov [#allocation2]   ;;  %s1793_s8 = smov [#allocation5]  }
  0x19   :  { %s78_s9 = sshll.u32 %s1793_s8, 4  ;;  %s106_s1 = sshll.u32 %s2199_s18, 4  ;;  %s79_s9 = int_to_ptr.vmem [resolvable:$true] %s78_s9  ;;  %s107_s1 = int_to_ptr.hbm [resolvable:$true] %s106_s1 }
  0x1a   :  { %84 = dma.hbm_to_vmem [thread:$0]  %s77_s4, 1024, %s79_s9, [#allocation3], %s1789_s10, %s1789_s10, %s1790_s29  }
  0x1b   :  { %s42_s3 = sshll.u32 %s2227_s16, 4  ;;  %s138_s11 = sshll.u32 %s2204_s23, 4  ;;  %s43_s3 = int_to_ptr.vmem [resolvable:$true] %s42_s3  ;;  %s139_s11 = int_to_ptr.hbm [resolvable:$true] %s138_s11 }
  0x1c   :  { %45 = dma.vmem_to_smem %s43_s3, 16, %s1792_s30, [#allocation4]  }
  0x1d   :  { %s1794_s14 = smov [#allocation8]   ;;  %s1795_s16 = smov [#allocation11]  }
  0x1e   :  { %s108_s2 = sshll.u32 %s1794_s14, 4  ;;  %s140_s18 = sshll.u32 %s1795_s16, 4  ;;  %s109_s2 = int_to_ptr.vmem [resolvable:$true] %s108_s2  ;;  %s141_s18 = int_to_ptr.vmem [resolvable:$true] %s140_s18 }
  0x1f   :  { %114 = dma.hbm_to_vmem [thread:$0]  %s107_s1, 1024, %s109_s2, [#allocation7], %s1789_s10, %s1789_s10, %s1790_s29  }
  0x20   :  { %s153_s7 = sshll.u32 %s2206_s25, 4  ;;  %s1796_s23 = smov [#allocation12]   ;;  %s154_s7 = int_to_ptr.hbm [resolvable:$true] %s153_s7 }
  0x21   :  { %146 = dma.hbm_to_vmem [thread:$0]  %s139_s11, 1024, %s141_s18, [#allocation10], %s1789_s10, %s1789_s10, %s1790_s29  }
  0x22   :  { %s155_s4 = sshll.u32 %s1796_s23, 4  ;;  %s156_s4 = int_to_ptr.vmem [resolvable:$true] %s155_s4 }
  0x23   :  { %161 = dma.hbm_to_vmem [thread:$0]  %s154_s7, 1024, %s156_s4, [#allocation13], %s1789_s10, %s1789_s10, %s1790_s29  }
  0x24   :  { %1778 = dma.done.wait [#allocation4], 16  }
  0x25   :  { %1779 = vsyncadd [#allocation4], 4294967280 }
  0x26   :  { %1780 = dma.done.wait [#allocation3], 1024  }
  0x27   :  { %1781 = vsyncadd [#allocation3], 4294966272 }
  0x28   :  { %1782 = dma.done.wait [#allocation7], 2048  }
  0x29   :  { %1783 = vsyncadd [#allocation7], 4294965248 }
  0x2a   :  { %1784 = dma.done.wait [#allocation10], 2048  }
  0x2b   :  { %1785 = vsyncadd [#allocation10], 4294965248 }
  0x2c   :  { %1786 = dma.done.wait [#allocation13], 1024  }
  0x2d   :  { %1787 = vsyncadd [#allocation13], 4294966272 }
  0x2e   :  { %192 = sfence }
  0x2f   :  { %s2228_s8 = sld [smem:[#allocation22_spill]]  ;;  %v1797_v2 = vmov 0   ;;  %v198_v22 = vlaneseq  ;;  %v1798_v27 = vmov 0.0   ;;  %vm336_vm2 = vcmask 130048  }
  0x30   :  { %1598 = vset.pattern.permute.xlu0 %v1797_v2  ;;  %1599 = vset.pattern.permute.xlu1 %v1797_v2  ;;  %s2229_s28 = sld [smem:[#allocation25_spill]]  ;;  %vm372_vm7 = vcmask 261120  }
  0x31   :  { %s2230_s1 = sld [smem:[#allocation21_spill]]  ;;  %v199_v24 = vand.u32 127, %v198_v22  ;;  %v2071_v48 = vshrl.u32 %v198_v22, 7 }
  0x32   :  { %s2231_s2 = sld [smem:[#allocation20_spill]] }
  0x33   :  { %s2232_s25 = sld [smem:[#allocation27_spill]]  ;;  %v2077_v55 = vadd.s32 8, %v2071_v48 }
  0x34   :  { %s2233_s6 = sld [smem:[#allocation26_spill]] }
  0x35   :  { %v194_v0 = vld [vmem:[%s2228_s8] sm:$0xff]  ;;  %v196_v1 = vld [vmem:[%s2228_s8 + $0x10] sm:$0xff]  ;;  %v195_v5 = vld [vmem:[%s2228_s8 + $0x8] sm:$0xff]  ;;  %s2235_s9 = sld [smem:[#allocation29_spill]] }
  0x36   :  { %v1522_v3 = vld [vmem:[%s2229_s28 + $0x38] sm:$0xff]  ;;  %201 = vperm.xlu0 %1598, %v194_v0   ;;  %207 = vperm.xlu1 %1599, %v196_v1   ;;  %v1521_v4 = vld [vmem:[%s2229_s28 + $0x30] sm:$0xff]  ;;  %v1520_v7 = vld [vmem:[%s2229_s28 + $0x28] sm:$0xff]  ;;  %s245_s0 = sld [smem:[#allocation2]] }
  0x37   :  { %316 = vmatpush.bf16.msra.mxu0 %v1522_v3  ;;  %v197_v6 = vld [vmem:[%s2228_s8 + $0x18] sm:$0xff]  ;;  %v1519_v8 = vld [vmem:[%s2229_s28 + $0x20] sm:$0xff]  ;;  %v1517_v10 = vld [vmem:[%s2229_s28 + $0x10] sm:$0xff]  ;;  %s2236_s30 = sld [smem:[#allocation28_spill]] }
  0x38   :  { %v1518_v9 = vld [vmem:[%s2229_s28 + $0x18] sm:$0xff]  ;;  %v1516_v11 = vld [vmem:[%s2229_s28 + $0x8] sm:$0xff]  ;;  %v1515_v12 = vld [vmem:[%s2229_s28] sm:$0xff]  ;;  %s2234_s28 = sld [smem:[#allocation23_spill]] }
  0x39   :  { %v239_v13 = vld [vmem:[%s2230_s1] sm:$0xff]  ;;  %v240_v14 = vld [vmem:[%s2230_s1 + $0x8] sm:$0xff]  ;;  %v241_v19 = vld [vmem:[%s2230_s1 + $0x10] sm:$0xff]  ;;  %s2237_s5 = sld [smem:[#allocation30_spill]] }
  0x3a   :  { %v2020_v15 = vpack.c.bf16 %v240_v14, %v239_v13  ;;  %v2026_v16 = vld [vmem:[%s2231_s2] sm:$0xff]  ;;  %v2031_v17 = vld [vmem:[%s2231_s2 + $0x8] sm:$0xff]  ;;  %v242_v20 = vld [vmem:[%s2230_s1 + $0x18] sm:$0xff]  ;;  %s2238_s16 = sld [smem:[#allocation24_spill]] }
  0x3b   :  { %317 = vmatpush.bf16.msra.mxu0 %v1521_v4  ;;  %v335_v18 = vpack.c.bf16 %v2031_v17, %v2026_v16  ;;  %v2041_v21 = vpack.c.bf16 %v242_v20, %v241_v19  ;;  %v1530_v38 = vld [vmem:[%s2232_s25 + $0x38] sm:$0xff]  ;;  %v1529_v40 = vld [vmem:[%s2232_s25 + $0x30] sm:$0xff]  ;;  %v1528_v42 = vld [vmem:[%s2232_s25 + $0x28] sm:$0xff] }
  0x3c   :  { %459 = vmatpush.bf16.msra.mxu3 %v1530_v38  ;;  %v1527_v44 = vld [vmem:[%s2232_s25 + $0x20] sm:$0xff]  ;;  %v1526_v49 = vld [vmem:[%s2232_s25 + $0x18] sm:$0xff] }
  0x3d   :  { %350 = vmatpush.bf16.msra.mxu1 %v335_v18  ;;  %v1600_v45 = vld [vmem:[%s2233_s6] ss:$0 sm:$0xff] }
  0x3e   :  { %204 = vperm.xlu0 %1598, %v195_v5   ;;  %210 = vperm.xlu1 %1599, %v197_v6   ;;  %v1601_v56 = vld [vmem:[%s2234_s28] ss:$0 sm:$0xff]  ;;  %v1525_v5 = vld [vmem:[%s2232_s25 + $0x10] sm:$0xff]  ;;  %v1524_v6 = vld [vmem:[%s2232_s25 + $0x8] sm:$0xff] }
  0x3f   :  { %318 = vmatpush.bf16.msra.mxu0 %v1520_v7  ;;  %vm227_vm5 = vcmp.eq.s32.totalorder %v1601_v56, %v2071_v48  ;;  %vm228_vm6 = vcmp.eq.s32.totalorder %v1601_v56, %v2077_v55  ;;  %v1523_v7 = vld [vmem:[%s2232_s25] sm:$0xff]  ;;  %s368_s25 = sadd.f32 1.0, %s245_s0 }
  0x40   :  { %460 = vmatpush.bf16.msra.mxu3 %v1529_v40  ;;  %v229_v1 = vsel %vm227_vm5, 1.0, %v1798_v27  ;;  %v230_v2 = vsel %vm228_vm6, 1.0, %v1798_v27 }
  0x41   :  { %v2086_v4 = vpack.c.bf16 %v230_v2, %v229_v1  ;;  %v369_v13 = vstv %s368_s25  ;;  %v1552_v2 = vld [vmem:[#allocation6 + $0x28] sm:$0xff] }
  0x42   :  { %v370_v14 = vmul.f32 %v369_v13, %v2026_v16  ;;  %v371_v18 = vmul.f32 %v369_v13, %v2031_v17  ;;  %v1532_v16 = vld [vmem:[%s2235_s9 + $0x8] sm:$0xff]  ;;  %v1531_v17 = vld [vmem:[%s2235_s9] sm:$0xff] }
  0x43   :  { %319 = vmatpush.bf16.msra.mxu0 %v1519_v8  ;;  %v1538_v8 = vld [vmem:[%s2235_s9 + $0x38] sm:$0xff] }
  0x44   :  { %461 = vmatpush.bf16.msra.mxu3 %v1528_v42  ;;  %544 = vmatpush.bf16.msrb.mxu1 %v1538_v8  ;;  %v1541_v42 = vld [vmem:[#allocation5 + $0x10] sm:$0xff] }
  0x47   :  { %320 = vmatpush.bf16.msra.mxu0 %v1518_v9  ;;  %v1537_v9 = vld [vmem:[%s2235_s9 + $0x30] sm:$0xff] }
  0x48   :  { %462 = vmatpush.bf16.msra.mxu3 %v1527_v44  ;;  %545 = vmatpush.bf16.msrb.mxu1 %v1537_v9  ;;  %v1539_v44 = vld [vmem:[#allocation5] sm:$0xff] }
  0x4b   :  { %321 = vmatpush.bf16.msra.mxu0 %v1517_v10  ;;  %v1536_v10 = vld [vmem:[%s2235_s9 + $0x28] sm:$0xff] }
  0x4c   :  { %463 = vmatpush.bf16.msra.mxu3 %v1526_v49  ;;  %546 = vmatpush.bf16.msrb.mxu1 %v1536_v10 }
  0x4f   :  { %322 = vmatpush.bf16.msra.mxu0 %v1516_v11  ;;  %v1535_v11 = vld [vmem:[%s2235_s9 + $0x20] sm:$0xff] }
  0x50   :  { %464 = vmatpush.bf16.msra.mxu3 %v1525_v5  ;;  %547 = vmatpush.bf16.msrb.mxu1 %v1535_v11  ;;  %v1551_v5 = vld [vmem:[#allocation6 + $0x20] sm:$0xff] }
  0x53   :  { %323 = vmatpush.bf16.msra.mxu0 %v1515_v12 }
  0x54   :  { %465 = vmatpush.bf16.msra.mxu3 %v1524_v6 }
  0x56   :  { %324 = vmatmul.bf16.vlgmr.msra.gmra.mxu0 %v2020_v15 }
  0x58   :  { %466 = vmatpush.bf16.msra.mxu3 %v1523_v7 }
  0x66   :  { %329 = vmatmul.bf16.gmra.mxu0 %v2041_v21 }
  0xa8   :  { %v202_v23 = vpop.permute.xlu0 %201  ;;  %v208_v25 = vpop.permute.xlu1 %207 }
  0xa9   :  { %vm212_vm0 = vcmp.eq.s32.totalorder %v202_v23, %v199_v24  ;;  %vm214_vm3 = vcmp.eq.s32.totalorder %v208_v25, %v199_v24  ;;  %v1533_v25 = vld [vmem:[%s2235_s9 + $0x10] sm:$0xff] }
  0xaa   :  { %v216_v28 = vsel %vm212_vm0, 1.0, %v1798_v27  ;;  %v218_v32 = vsel %vm214_vm3, 1.0, %v1798_v27 }
  0xb0   :  { %v205_v26 = vpop.permute.xlu0 %204  ;;  %v211_v31 = vpop.permute.xlu1 %210 }
  0xb1   :  { %vm213_vm1 = vcmp.eq.s32.totalorder %v205_v26, %v199_v24  ;;  %vm215_vm4 = vcmp.eq.s32.totalorder %v211_v31, %v199_v24  ;;  %v1534_v24 = vld [vmem:[%s2235_s9 + $0x18] sm:$0xff]  ;;  %v1543_v31 = vld [vmem:[#allocation5 + $0x20] sm:$0xff] }
  0xb2   :  { %v217_v29 = vsel %vm213_vm1, 1.0, %v1798_v27  ;;  %v219_v33 = vsel %vm215_vm4, 1.0, %v1798_v27  ;;  %548 = vmatpush.bf16.msrb.mxu1 %v1534_v24  ;;  %v1546_v26 = vld [vmem:[#allocation5 + $0x38] sm:$0xff] }
  0xb3   :  { %v2046_v30 = vpack.c.bf16 %v217_v29, %v216_v28  ;;  %v2052_v34 = vpack.c.bf16 %v219_v33, %v218_v32  ;;  %v1545_v28 = vld [vmem:[#allocation5 + $0x30] sm:$0xff]  ;;  %v1544_v29 = vld [vmem:[#allocation5 + $0x28] sm:$0xff]  ;;  %v1542_v32 = vld [vmem:[#allocation5 + $0x18] sm:$0xff] }
  0xb5   :  { %1248 = vmatmul.msk.bf16.vlgmr.msra.gmra.mxu1 %vm336_vm2, %v2046_v30 }
  0xb6   :  { %549 = vmatpush.bf16.msrb.mxu1 %v1533_v25 }
  0xba   :  { %550 = vmatpush.bf16.msrb.mxu1 %v1532_v16  ;;  %v1549_v16 = vld [vmem:[#allocation6 + $0x10] sm:$0xff] }
  0xbe   :  { %551 = vmatpush.bf16.msrb.mxu1 %v1531_v17  ;;  %v1548_v17 = vld [vmem:[#allocation6 + $0x8] sm:$0xff] }
  0xc5   :  { %1249 = vmatmul.msk.bf16.gmra.mxu1 %vm336_vm2, %v2052_v34 }
  0xd3   :  { %v325_v35 = vpop.f32.mrf.mxu0 }
  0xd4   :  { %v326_v50 = vadd.f32 %v1600_v45, %v325_v35  ;;  %v1603_v35 = vld [vmem:[%s2236_s30] ss:$0 sm:$0xff] }
  0xdb   :  { %v327_v36 = vpop.f32.mrf.mxu0 }
  0xdc   :  { %v328_v51 = vadd.f32 %v1600_v45, %v327_v36 }
  0xe3   :  { %v330_v41 = vpop.f32.mrf.mxu0 }
  0xe4   :  { %v331_v46 = vadd.f32 %v1600_v45, %v330_v41 }
  0xeb   :  { %v332_v47 = vpop.f32.mrf.mxu0 }
  0xec   :  { %v333_v52 = vadd.f32 %v1600_v45, %v332_v47  ;;  %v1604_v45 = vld [vmem:[%s2237_s5] ss:$0 sm:$0xff] }
 0x132   :  { %v352_v37 = vpop.f32.mrf.mxu1 }
 0x133   :  { %v353_v59 = vadd.f32 %v352_v37, %v326_v50  ;;  %v1605_v50 = vld [vmem:[%s2193_s12] ss:$0 sm:$0xff] }
 0x135   :  { %v362_v0 = vmax.f32 %v353_v59, 0.0 }
 0x13a   :  { %v354_v39 = vpop.f32.mrf.mxu1 }
 0x13b   :  { %v355_v57 = vadd.f32 %v354_v39, %v328_v51 }
 0x13d   :  { %v363_v62 = vmax.f32 %v355_v57, 0.0 }
 0x13f   :  { %v366_v3 = vpack.c.bf16 %v363_v62, %v362_v0  ;;  %v1554_v62 = vld [vmem:[#allocation6 + $0x38] sm:$0xff]  ;;  %v1553_v0 = vld [vmem:[#allocation6 + $0x30] sm:$0xff] }
 0x140   :  { %773 = vmatpush.bf16.msrb.mxu0 %v1554_v62  ;;  %v1568_v62 = vld [vmem:[#allocation9 + $0x28] sm:$0xff] }
 0x142   :  { %v357_v43 = vpop.f32.mrf.mxu1 }
 0x143   :  { %v358_v53 = vadd.f32 %v357_v43, %v331_v46  ;;  %v1540_v43 = vld [vmem:[#allocation5 + $0x8] sm:$0xff] }
 0x144   :  { %774 = vmatpush.bf16.msrb.mxu0 %v1553_v0 }
 0x145   :  { %v364_v60 = vmax.f32 %v358_v53, 0.0 }
 0x148   :  { %775 = vmatpush.bf16.msrb.mxu0 %v1552_v2  ;;  %v1566_v2 = vld [vmem:[#allocation9 + $0x18] sm:$0xff] }
 0x14a   :  { %v359_v54 = vpop.f32.mrf.mxu1 }
 0x14b   :  { %v360_v58 = vadd.f32 %v359_v54, %v333_v52 }
 0x14c   :  { %776 = vmatpush.bf16.msrb.mxu0 %v1551_v5  ;;  %v1610_v5 = vld [vmem:[%s2201_s20] ss:$0 sm:$0xff] }
 0x14d   :  { %v365_v61 = vmax.f32 %v360_v58, 0.0 }
 0x14f   :  { %v367_v63 = vpack.c.bf16 %v365_v61, %v364_v60 }
 0x151   :  { %382 = vmatpush.bf16.msra.mxu2 %v367_v63 }
 0x155   :  { %383 = vmatpush.bf16.msra.mxu2 %v366_v3 }
 0x158   :  { %1250 = vmatmul.msk.bf16.vlgmr.msra.gmra.mxu2 %vm372_vm7, %v2086_v4 }
 0x159   :  { %641 = vmatpush.bf16.msrb.mxu2 %v1546_v26  ;;  %v1547_v26 = vld [vmem:[#allocation6] sm:$0xff] }
 0x15d   :  { %642 = vmatpush.bf16.msrb.mxu2 %v1545_v28  ;;  %v1562_v28 = vld [vmem:[#allocation8 + $0x38] sm:$0xff] }
 0x161   :  { %643 = vmatpush.bf16.msrb.mxu2 %v1544_v29  ;;  %v1561_v29 = vld [vmem:[#allocation8 + $0x30] sm:$0xff] }
 0x165   :  { %644 = vmatpush.bf16.msrb.mxu2 %v1543_v31  ;;  %v1560_v31 = vld [vmem:[#allocation8 + $0x28] sm:$0xff] }
 0x169   :  { %645 = vmatpush.bf16.msrb.mxu2 %v1542_v32  ;;  %v1559_v32 = vld [vmem:[#allocation8 + $0x20] sm:$0xff] }
 0x16d   :  { %646 = vmatpush.bf16.msrb.mxu2 %v1541_v42  ;;  %v1557_v42 = vld [vmem:[#allocation8 + $0x10] sm:$0xff] }
 0x171   :  { %647 = vmatpush.bf16.msrb.mxu2 %v1540_v43  ;;  %v1556_v43 = vld [vmem:[#allocation8 + $0x8] sm:$0xff] }
 0x175   :  { %648 = vmatpush.bf16.msrb.mxu2 %v1539_v44  ;;  %v1555_v44 = vld [vmem:[#allocation8] sm:$0xff] }
 0x178   :  { %649 = vmatmul.bf16.vlgmr.msrb.gmra.mxu2 %v2020_v15  ;;  %v1606_v15 = vld [vmem:[%s2194_s13] ss:$0 sm:$0xff] }
 0x179   :  { %858 = vmatpush.bf16.msra.mxu2 %v1562_v28 }
 0x17d   :  { %859 = vmatpush.bf16.msra.mxu2 %v1561_v29 }
 0x181   :  { %860 = vmatpush.bf16.msra.mxu2 %v1560_v31 }
 0x185   :  { %861 = vmatpush.bf16.msra.mxu2 %v1559_v32  ;;  %v1583_v32 = vld [vmem:[#allocation12 + $0x20] sm:$0xff] }
 0x188   :  { %654 = vmatmul.bf16.gmra.mxu2 %v2041_v21 }
 0x1db   :  { %v385_v12 = vpop.f32.mrf.mxu2 }
 0x1dc   :  { %v386_v20 = vadd.f32 %v385_v12, %v370_v14 }
 0x1e3   :  { %v387_v19 = vpop.f32.mrf.mxu2 }
 0x1e4   :  { %v388_v22 = vadd.f32 %v387_v19, %v371_v18 }
 0x1e6   :  { %v406_v23 = vpack.c.bf16 %v388_v22, %v386_v20 }
 0x1e8   :  { %467 = vmatmul.bf16.vlgmr.msra.gmra.mxu3 %v406_v23 }
 0x1fb   :  { %v650_v59 = vpop.f32.mrf.mxu2 }
 0x203   :  { %v652_v60 = vpop.f32.mrf.mxu2 }
 0x20b   :  { %v655_v1 = vpop.f32.mrf.mxu2 }
 0x213   :  { %v657_v7 = vpop.f32.mrf.mxu2 }
 0x26b   :  { %v468_v33 = vpop.f32.mrf.mxu3 }
 0x26c   :  { %v469_v36 = vadd.f32 %v1603_v35, %v468_v33 }
 0x26e   :  { %v473_v39 = vmax.f32 %v469_v36, 0.0 }
 0x273   :  { %v470_v37 = vpop.f32.mrf.mxu3 }
 0x274   :  { %v471_v38 = vadd.f32 %v1603_v35, %v470_v37 }
 0x276   :  { %v474_v40 = vmax.f32 %v471_v38, 0.0 }
 0x278   :  { %v491_v41 = vpack.c.bf16 %v474_v40, %v473_v39 }
 0x27a   :  { %552 = vmatmul.bf16.vlgmr.msrb.gmra.mxu1 %v491_v41  ;;  %v1558_v41 = vld [vmem:[#allocation8 + $0x18] sm:$0xff] }
 0x27b   :  { %862 = vmatpush.bf16.msra.mxu2 %v1558_v41 }
 0x27f   :  { %863 = vmatpush.bf16.msra.mxu2 %v1557_v42 }
 0x283   :  { %864 = vmatpush.bf16.msra.mxu2 %v1556_v43 }
 0x287   :  { %865 = vmatpush.bf16.msra.mxu2 %v1555_v44 }
 0x2f7   :  { %v553_v46 = vpop.f32.mrf.mxu1 }
 0x2f8   :  { %v554_v47 = vadd.f32 %v1604_v45, %v553_v46  ;;  %v1608_v46 = vld [vmem:[%s2198_s17] ss:$0 sm:$0xff] }
 0x2fa   :  { %v558_v49 = vmax.f32 %v554_v47, 0.0 }
 0x2fc   :  { %v564_v53 = vmul.f32 %v1605_v50, %v558_v49 }
 0x2fe   :  { %v570_v56 = vadd.f32 %v1606_v15, %v564_v53 }
 0x2ff   :  { %v555_v51 = vpop.f32.mrf.mxu1 }
 0x300   :  { %v556_v52 = vadd.f32 %v1604_v45, %v555_v51 }
 0x302   :  { %v559_v54 = vmax.f32 %v556_v52, 0.0 }
 0x304   :  { %v565_v21 = vmul.f32 %v1605_v50, %v559_v54  ;;  %v1602_v54 = vld [vmem:[%s2238_s16] ss:$0 sm:$0xff] }
 0x305   :  { %vm235_vm8 = vcmp.eq.s32.totalorder %v1602_v54, %v2077_v55  ;;  %vm234_vm9 = vcmp.eq.s32.totalorder %v1602_v54, %v2071_v48  ;;  %v1609_v55 = vld [vmem:[%s2200_s19] ss:$0 sm:$0xff] }
 0x306   :  { %v571_v57 = vadd.f32 %v1606_v15, %v565_v21  ;;  %v237_v15 = vsel %vm235_vm8, 1.0, %v1798_v27  ;;  %v236_v21 = vsel %vm234_vm9, 1.0, %v1798_v27  ;;  %v1575_v27 = vld [vmem:[#allocation11 + $0x20] sm:$0xff] }
 0x308   :  { %v660_v58 = vpack.c.bf16 %v571_v57, %v570_v56 }
 0x30a   :  { %668 = vmatpush.bf16.msrb.mxu3 %v660_v58 }
 0x30d   :  { %1348 = vmatmul.msk.bf16.vlgmr.msrb.gmra.mxu3 %vm336_vm2, %v2046_v30  ;;  %v1607_v30 = vld [vmem:[%s2196_s15] ss:$0 sm:$0xff]  ;;  %s1315_s15 = sld [smem:[#allocation2 + $0x1]] }
 0x30e   :  { %v656_v6 = vadd.f32 %v1607_v30, %v655_v1  ;;  %v651_v8 = vadd.f32 %v1607_v30, %v650_v59  ;;  %v653_v9 = vadd.f32 %v1607_v30, %v652_v60  ;;  %v658_v10 = vadd.f32 %v1607_v30, %v657_v7  ;;  %v1577_v59 = vld [vmem:[#allocation11 + $0x30] sm:$0xff]  ;;  %v1574_v1 = vld [vmem:[#allocation11 + $0x18] sm:$0xff] }
 0x30f   :  { %v1569_v60 = vld [vmem:[#allocation9 + $0x30] sm:$0xff] }
 0x313   :  { %s686_s6 = sadd.f32 1.0, %s1315_s15 }
 0x315   :  { %v687_v35 = vstv %s686_s6 }
 0x316   :  { %v688_v36 = vmul.f32 %v687_v35, %v570_v56  ;;  %v238_v56 = vpack.c.bf16 %v237_v15, %v236_v21 }
 0x31d   :  { %1349 = vmatmul.msk.bf16.gmra.mxu3 %vm336_vm2, %v2052_v34  ;;  %v1550_v34 = vld [vmem:[#allocation6 + $0x18] sm:$0xff] }
 0x31e   :  { %777 = vmatpush.bf16.msrb.mxu0 %v1550_v34  ;;  %v1611_v34 = vld [vmem:[%s2202_s21] ss:$0 sm:$0xff] }
 0x322   :  { %778 = vmatpush.bf16.msrb.mxu0 %v1549_v16  ;;  %v1586_v16 = vld [vmem:[#allocation12 + $0x38] sm:$0xff] }
 0x323   :  { %1153 = vmatpush.bf16.msrb.mxu2 %v1586_v16 }
 0x326   :  { %779 = vmatpush.bf16.msrb.mxu0 %v1548_v17  ;;  %v1585_v17 = vld [vmem:[#allocation12 + $0x30] sm:$0xff] }
 0x327   :  { %1154 = vmatpush.bf16.msrb.mxu2 %v1585_v17 }
 0x32a   :  { %780 = vmatpush.bf16.msrb.mxu0 %v1547_v26  ;;  %v1584_v26 = vld [vmem:[#allocation12 + $0x28] sm:$0xff] }
 0x32b   :  { %1155 = vmatpush.bf16.msrb.mxu2 %v1584_v26 }
 0x32f   :  { %1156 = vmatpush.bf16.msrb.mxu2 %v1583_v32 }
 0x390   :  { %v670_v61 = vpop.f32.mrf.mxu3 }
 0x391   :  { %v671_v18 = vadd.f32 %v670_v61, %v651_v8  ;;  %v1576_v61 = vld [vmem:[#allocation11 + $0x28] sm:$0xff] }
 0x393   :  { %v680_v24 = vmax.f32 %v671_v18, 0.0  ;;  %v1564_v18 = vld [vmem:[#allocation9 + $0x8] sm:$0xff] }
 0x398   :  { %v672_v63 = vpop.f32.mrf.mxu3 }
 0x399   :  { %v673_v13 = vadd.f32 %v672_v63, %v653_v9  ;;  %v1567_v63 = vld [vmem:[#allocation9 + $0x20] sm:$0xff] }
 0x39b   :  { %v681_v22 = vmax.f32 %v673_v13, 0.0  ;;  %v1565_v13 = vld [vmem:[#allocation9 + $0x10] sm:$0xff] }
 0x39d   :  { %v684_v25 = vpack.c.bf16 %v681_v22, %v680_v24  ;;  %v1572_v24 = vld [vmem:[#allocation11 + $0x8] sm:$0xff] }
 0x3a0   :  { %v675_v3 = vpop.f32.mrf.mxu3 }
 0x3a1   :  { %v676_v11 = vadd.f32 %v675_v3, %v656_v6 }
 0x3a3   :  { %v682_v19 = vmax.f32 %v676_v11, 0.0 }
 0x3a8   :  { %v677_v12 = vpop.f32.mrf.mxu3 }
 0x3a9   :  { %v678_v14 = vadd.f32 %v677_v12, %v658_v10 }
 0x3ab   :  { %v683_v20 = vmax.f32 %v678_v14, 0.0 }
 0x3ad   :  { %v685_v23 = vpack.c.bf16 %v683_v20, %v682_v19  ;;  %v1563_v19 = vld [vmem:[#allocation9] sm:$0xff]  ;;  %v1573_v20 = vld [vmem:[#allocation11 + $0x10] sm:$0xff] }
 0x3af   :  { %696 = vmatpush.bf16.msra.mxu1 %v685_v23 }
 0x3b3   :  { %697 = vmatpush.bf16.msra.mxu1 %v684_v25  ;;  %v1571_v25 = vld [vmem:[#allocation11] sm:$0xff] }
 0x3b6   :  { %1350 = vmatmul.msk.bf16.vlgmr.msra.gmra.mxu1 %vm372_vm7, %v2086_v4  ;;  %v689_v4 = vmul.f32 %v687_v35, %v571_v57  ;;  %v1578_v57 = vld [vmem:[#allocation11 + $0x38] sm:$0xff]  ;;  %v1581_v35 = vld [vmem:[#allocation12 + $0x10] sm:$0xff] }
 0x3b7   :  { %896 = vmatpush.bf16.msrb.mxu1 %v660_v58  ;;  %v1570_v58 = vld [vmem:[#allocation9 + $0x38] sm:$0xff]  ;;  %1000 = vmatpush.bf16.msra.mxu3 %v1578_v57 }
 0x3bb   :  { %1062 = vmatpush.bf16.msra.mxu1 %v1570_v58  ;;  %1001 = vmatpush.bf16.msra.mxu3 %v1577_v59 }
 0x3bf   :  { %1063 = vmatpush.bf16.msra.mxu1 %v1569_v60  ;;  %1002 = vmatpush.bf16.msra.mxu3 %v1576_v61 }
 0x3c3   :  { %1064 = vmatpush.bf16.msra.mxu1 %v1568_v62  ;;  %1003 = vmatpush.bf16.msra.mxu3 %v1575_v27 }
 0x3c6   :  { %1415 = vmatmul.msk.bf16.vlgmr.msrb.gmra.mxu1 %vm336_vm2, %v238_v56 }
 0x3c7   :  { %1065 = vmatpush.bf16.msra.mxu1 %v1567_v63  ;;  %1004 = vmatpush.bf16.msra.mxu3 %v1574_v1 }
 0x3cb   :  { %1066 = vmatpush.bf16.msra.mxu1 %v1566_v2  ;;  %1005 = vmatpush.bf16.msra.mxu3 %v1573_v20 }
 0x3cf   :  { %1067 = vmatpush.bf16.msra.mxu1 %v1565_v13  ;;  %1006 = vmatpush.bf16.msra.mxu3 %v1572_v24 }
 0x3d3   :  { %1068 = vmatpush.bf16.msra.mxu1 %v1564_v18  ;;  %1007 = vmatpush.bf16.msra.mxu3 %v1571_v25 }
 0x3d7   :  { %1069 = vmatpush.bf16.msra.mxu1 %v1563_v19 }
 0x433   :  { %v699_v33 = vpop.f32.mrf.mxu1 }
 0x434   :  { %v700_v38 = vadd.f32 %v699_v33, %v688_v36  ;;  %v1582_v33 = vld [vmem:[#allocation12 + $0x18] sm:$0xff]  ;;  %v1580_v36 = vld [vmem:[#allocation12 + $0x8] sm:$0xff] }
 0x435   :  { %1157 = vmatpush.bf16.msrb.mxu2 %v1582_v33 }
 0x439   :  { %1158 = vmatpush.bf16.msrb.mxu2 %v1581_v35 }
 0x43b   :  { %v701_v37 = vpop.f32.mrf.mxu1 }
 0x43c   :  { %v702_v39 = vadd.f32 %v701_v37, %v689_v4  ;;  %v1579_v4 = vld [vmem:[#allocation12] sm:$0xff] }
 0x43d   :  { %1159 = vmatpush.bf16.msrb.mxu2 %v1580_v36 }
 0x43e   :  { %v720_v40 = vpack.c.bf16 %v702_v39, %v700_v38 }
 0x440   :  { %781 = vmatmul.bf16.vlgmr.msrb.gmra.mxu0 %v720_v40  ;;  %v1612_v40 = vld [vmem:[%s2205_s24] ss:$0 sm:$0xff] }
 0x441   :  { %1160 = vmatpush.bf16.msrb.mxu2 %v1579_v4 }
 0x443   :  { %v898_v14 = vpop.f32.mrf.mxu1 }
 0x44b   :  { %v900_v22 = vpop.f32.mrf.mxu1 }
 0x44c   :  { %v934_v23 = vpack.c.bf16 %v900_v22, %v898_v14 }
 0x44e   :  { %1070 = vmatmul.bf16.vlgmr.msra.gmra.mxu1 %v934_v23 }
 0x4bd   :  { %v782_v45 = vpop.f32.mrf.mxu0 }
 0x4be   :  { %v783_v47 = vadd.f32 %v1608_v46, %v782_v45 }
 0x4c0   :  { %v787_v51 = vmax.f32 %v783_v47, 0.0 }
 0x4c5   :  { %v784_v49 = vpop.f32.mrf.mxu0 }
 0x4c6   :  { %v785_v50 = vadd.f32 %v1608_v46, %v784_v49 }
 0x4c8   :  { %v788_v52 = vmax.f32 %v785_v50, 0.0  ;;  %v1613_v50 = vld [vmem:[%s2207_s26] ss:$0 sm:$0xff] }
 0x4ca   :  { %v805_v53 = vpack.c.bf16 %v788_v52, %v787_v51 }
 0x4cb   :  { %v1071_v37 = vpop.f32.mrf.mxu1 }
 0x4cc   :  { %866 = vmatmul.bf16.vlgmr.msra.gmra.mxu2 %v805_v53 }
 0x4d3   :  { %v1073_v41 = vpop.f32.mrf.mxu1 }
 0x54f   :  { %v867_v48 = vpop.f32.mrf.mxu2 }
 0x550   :  { %v868_v0 = vadd.f32 %v1609_v55, %v867_v48 }
 0x552   :  { %v872_v3 = vmax.f32 %v868_v0, 0.0 }
 0x554   :  { %v878_v7 = vmul.f32 %v1610_v5, %v872_v3 }
 0x556   :  { %v884_v10 = vadd.f32 %v1611_v34, %v878_v7 }
 0x557   :  { %v869_v30 = vpop.f32.mrf.mxu2 }
 0x558   :  { %v870_v6 = vadd.f32 %v1609_v55, %v869_v30 }
 0x55a   :  { %v873_v8 = vmax.f32 %v870_v6, 0.0 }
 0x55c   :  { %v879_v9 = vmul.f32 %v1610_v5, %v873_v8 }
 0x55e   :  { %v885_v11 = vadd.f32 %v1611_v34, %v879_v9 }
 0x560   :  { %v903_v12 = vpack.c.bf16 %v885_v11, %v884_v10 }
 0x562   :  { %911 = vmatpush.bf16.msra.mxu0 %v903_v12 }
 0x565   :  { %1416 = vmatmul.msk.bf16.vlgmr.msra.gmra.mxu0 %vm336_vm2, %v238_v56 }
 0x5e2   :  { %v913_v28 = vpop.f32.mrf.mxu0 }
 0x5ea   :  { %v915_v29 = vpop.f32.mrf.mxu0 }
 0x5eb   :  { %v951_v31 = vpack.c.bf16 %v915_v29, %v913_v28 }
 0x5ed   :  { %1008 = vmatmul.bf16.vlgmr.msra.gmra.mxu3 %v951_v31 }
 0x670   :  { %v1009_v38 = vpop.f32.mrf.mxu3 }
 0x671   :  { %v1072_v39 = vadd.f32 %v1071_v37, %v1009_v38 }
 0x673   :  { %v1080_v43 = vadd.f32 %v1612_v40, %v1072_v39 }
 0x675   :  { %v1082_v46 = vmax.f32 %v1080_v43, 0.0 }
 0x678   :  { %v1011_v42 = vpop.f32.mrf.mxu3 }
 0x679   :  { %v1074_v44 = vadd.f32 %v1073_v41, %v1011_v42 }
 0x67b   :  { %v1081_v45 = vadd.f32 %v1612_v40, %v1074_v44 }
 0x67d   :  { %v1083_v47 = vmax.f32 %v1081_v45, 0.0 }
 0x67f   :  { %v1100_v49 = vpack.c.bf16 %v1083_v47, %v1082_v46 }
 0x681   :  { %1161 = vmatmul.bf16.vlgmr.msrb.gmra.mxu2 %v1100_v49 }
 0x704   :  { %v1162_v51 = vpop.f32.mrf.mxu2 }
 0x705   :  { %v1163_v52 = vadd.f32 %v1613_v50, %v1162_v51 }
 0x707   :  { %v1513_v53 = vmul.f32 -1.442695, %v1163_v52 }
 0x709   :  { %1614 = vpow2.f32 %v1513_v53 }
 0x70c   :  { %v1164_v54 = vpop.f32.mrf.mxu2 }
 0x70d   :  { %v1165_v15 = vadd.f32 %v1613_v50, %v1164_v54 }
 0x70f   :  { %v1615_v21 = vpop.eup %1614  ;;  %v1514_v56 = vmul.f32 -1.442695, %v1165_v15 }
 0x710   :  { %v1173_v57 = vadd.f32 1.0, %v1615_v21 }
 0x711   :  { %1616 = vpow2.f32 %v1514_v56 }
 0x712   :  { %1618 = vrcp.f32 %v1173_v57  ;;  %v1186_v55 = vand.u32 2147483648, %v1173_v57  ;;  %v1184_v27 = vand.u32 2147483647, %v1173_v57  ;;  %vm1180_vm11 = vweird.f32 %v1173_v57 }
 0x714   :  { %v1187_v1 = vor.u32 1.1754944e-38, %v1186_v55  ;;  %vm1185_vm13 = vcmp.eq.f32.partialorder %v1184_v27, 8.507059e+37 }
 0x717   :  { %v1617_v58 = vpop.eup %1616 }
 0x718   :  { %v1619_v59 = vpop.eup %1618  ;;  %v1174_v60 = vadd.f32 1.0, %v1617_v58 }
 0x719   :  { %v1176_v61 = vmul.f32 %v1619_v59, %v1173_v57  ;;  %vm1181_vm10 = vweird.f32 %v1619_v59 }
 0x71a   :  { %1620 = vrcp.f32 %v1174_v60  ;;  %vm1182_vm12 = vmor %vm1180_vm11, %vm1181_vm10  ;;  %v1201_v6 = vand.u32 2147483648, %v1174_v60  ;;  %v1199_v34 = vand.u32 2147483647, %v1174_v60  ;;  %vm1195_vm15 = vweird.f32 %v1174_v60 }
 0x71b   :  { %v1177_v62 = vsub.f32 1.0, %v1176_v61 }
 0x71c   :  { %v1202_v9 = vor.u32 1.1754944e-38, %v1201_v6  ;;  %vm1200_vm1 = vcmp.eq.f32.partialorder %v1199_v34, 8.507059e+37 }
 0x71d   :  { %v1178_v48 = vmul.f32 %v1619_v59, %v1177_v62 }
 0x71f   :  { %v1179_v63 = vadd.f32 %v1619_v59, %v1178_v48 }
 0x720   :  { %v1621_v0 = vpop.eup %1620 }
 0x721   :  { %v1183_v2 = vsel %vm1182_vm12, %v1619_v59, %v1179_v63  ;;  %v1191_v3 = vmul.f32 %v1621_v0, %v1174_v60  ;;  %vm1196_vm14 = vweird.f32 %v1621_v0 }
 0x722   :  { %v1188_v5 = vsel %vm1185_vm13, %v1187_v1, %v1183_v2  ;;  %vm1197_vm0 = vmor %vm1195_vm15, %vm1196_vm14 }
 0x723   :  { %1205 = vst [vmem:[%s2208_s27] sm:$0xff] %v1188_v5  ;;  %v1192_v30 = vsub.f32 1.0, %v1191_v3 }
 0x725   :  { %v1193_v7 = vmul.f32 %v1621_v0, %v1192_v30 }
 0x727   :  { %v1194_v8 = vadd.f32 %v1621_v0, %v1193_v7 }
 0x729   :  { %v1198_v10 = vsel %vm1197_vm0, %v1621_v0, %v1194_v8 }
 0x72a   :  { %v1203_v11 = vsel %vm1200_vm1, %v1202_v9, %v1198_v10 }
 0x72b   :  { %1206 = vst [vmem:[%s2208_s27 + $0x8] sm:$0xff] %v1203_v11 }
 0x72c   :  { %1211 = vsyncpa [#allocation3], 1 }
 0x72d   :  { %1212 = vsyncpa [#allocation7], 1 }
 0x72e   :  { %1213 = vsyncpa [#allocation10], 1 }
 0x72f   :  { %1214 = vsyncpa [#allocation13], 1 }
 0x730   :  { %1215 = vsyncpa [#allocation4], 1 }

</bundles_post_ra>
